<compile_context>
chip_gen: v7x
topology: tpu7x:2x2x1
jax: 0.10.0
libtpu: 0.0.40
codegen_flags: <defaults>
</compile_context>

<pallas_src>
import jax
import jax.numpy as jnp
from jax.experimental import pallas as pl
from jax.experimental.pallas import tpu as pltpu


def _pick_tile(extent, unit, max_tile):
    """Largest tile t <= max_tile with t % unit == 0 and extent % t == 0.

    Falls back to the full extent (always legal for a BlockSpec block dim)
    when the extent is already small or no aligned even divisor exists.
    """
    if extent <= max_tile:
        return extent
    t = (max_tile // unit) * unit
    while t >= unit:
        if extent % t == 0:
            return t
        t -= unit
    return extent


# ---------------------------------------------------------------------------
# Pass 1: per-row (= per (n, c) pair) sum and sum-of-squares, accumulated in
# the resident output blocks across the "arbitrary" lane-tile grid axis.
#   x_ref   : (tr, th) native dtype, VMEM
#   sum_ref : (tr, 1)  f32, VMEM (resident across j)
#   ssq_ref : (tr, 1)  f32, VMEM (resident across j)
# ---------------------------------------------------------------------------
def _stats_kernel(x_ref, sum_ref, ssq_ref):
    j = pl.program_id(1)

    @pl.when(j == 0)
    def _():
        sum_ref[...] = jnp.zeros_like(sum_ref)
        ssq_ref[...] = jnp.zeros_like(ssq_ref)

    x = x_ref[...].astype(jnp.float32)
    sum_ref[...] += jnp.sum(x, axis=1, keepdims=True)
    ssq_ref[...] += jnp.sum(x * x, axis=1, keepdims=True)


# ---------------------------------------------------------------------------
# Pass 2: BatchNorm + adaptive mix folded into a single per-channel affine:
#   o = a_c * x + b_c       (a_c, b_c broadcast along lanes from (tr, 1))
# ---------------------------------------------------------------------------
def _affine_kernel(x_ref, a_ref, b_ref, o_ref):
    x = x_ref[...].astype(jnp.float32)
    o_ref[...] = (a_ref[...] * x + b_ref[...]).astype(o_ref.dtype)


def adaptive_norm(x, w0, w1, gamma, beta, eps=1e-3,
                  max_row_tile=256, max_hw_tile=2048):
    """AdaptiveNorm forward: w0 * x + w1 * BatchNorm2d(x), x is (N, C, H, W)."""
    N, C, H, W = x.shape
    NC, HW = N * C, H * W
    xr = x.reshape(NC, HW)                          # free, contiguous reshape

    tr = _pick_tile(NC, 8, max_row_tile)            # sublane-aligned row tile
    th = _pick_tile(HW, 128, max_hw_tile)           # lane-aligned HW tile
    grid = (NC // tr, HW // th)

    # ---- pass 1: per-row sum / sum-of-squares ------------------------------
    row_sum, row_ssq = pl.pallas_call(
        _stats_kernel,
        out_shape=(jax.ShapeDtypeStruct((NC, 1), jnp.float32),
                   jax.ShapeDtypeStruct((NC, 1), jnp.float32)),
        grid_spec=pltpu.PrefetchScalarGridSpec(
            num_scalar_prefetch=0,
            grid=grid,
            in_specs=[pl.BlockSpec((tr, th), lambda i, j: (i, j))],
            out_specs=(pl.BlockSpec((tr, 1), lambda i, j: (i, 0)),
                       pl.BlockSpec((tr, 1), lambda i, j: (i, 0)))),
        compiler_params=pltpu.CompilerParams(
            dimension_semantics=("parallel", "arbitrary")),
    )(xr)

    # ---- tiny per-channel coefficient math on (C,) vectors (pure JAX) ------
    count = jnp.float32(N * H * W)
    ch_sum = jnp.sum(row_sum.reshape(N, C), axis=0)
    ch_ssq = jnp.sum(row_ssq.reshape(N, C), axis=0)
    mean = ch_sum / count
    var = jnp.maximum(ch_ssq / count - mean * mean, 0.0)    # biased variance
    inv_std = jax.lax.rsqrt(var + jnp.float32(eps))

    g_f = jnp.asarray(gamma, jnp.float32)
    be_f = jnp.asarray(beta, jnp.float32)
    w0_f = jnp.asarray(w0, jnp.float32).reshape(())
    w1_f = jnp.asarray(w1, jnp.float32).reshape(())

    a_c = w0_f + w1_f * g_f * inv_std                       # (C,)
    b_c = w1_f * (be_f - g_f * mean * inv_std)               # (C,)
    a_rows = jnp.tile(a_c, N).reshape(NC, 1)                 # row = n*C + c
    b_rows = jnp.tile(b_c, N).reshape(NC, 1)

    # ---- pass 2: o = a_c * x + b_c -----------------------------------------
    out = pl.pallas_call(
        _affine_kernel,
        out_shape=jax.ShapeDtypeStruct((NC, HW), x.dtype),
        grid_spec=pltpu.PrefetchScalarGridSpec(
            num_scalar_prefetch=0,
            grid=grid,
            in_specs=[pl.BlockSpec((tr, th), lambda i, j: (i, j)),
                      pl.BlockSpec((tr, 1), lambda i, j: (i, 0)),
                      pl.BlockSpec((tr, 1), lambda i, j: (i, 0))],
            out_specs=pl.BlockSpec((tr, th), lambda i, j: (i, j))),
        compiler_params=pltpu.CompilerParams(
            dimension_semantics=("parallel", "parallel")),
    )(xr, a_rows, b_rows)

    return out.reshape(N, C, H, W)


# ---------------------------------------------------------------------------
# Pure-JAX reference (mirrors PyTorch training-mode BatchNorm2d semantics).
# ---------------------------------------------------------------------------
def adaptive_norm_ref(x, w0, w1, gamma, beta, eps=1e-3):
    xf = x.astype(jnp.float32)
    mean = jnp.mean(xf, axis=(0, 2, 3), keepdims=True)
    var = jnp.mean(jnp.square(xf - mean), axis=(0, 2, 3), keepdims=True)
    x_hat = (xf - mean) / jnp.sqrt(var + eps)
    bn = gamma[None, :, None, None] * x_hat + beta[None, :, None, None]
    return (w0 * xf + w1 * bn).astype(x.dtype)


if __name__ == "__main__":
    key = jax.random.PRNGKey(0)
    kx, kg, kb = jax.random.split(key, 3)

    N, C, H, W = 2, 4, 16, 16
    x = jax.random.normal(kx, (N, C, H, W), jnp.float32)

    # Module defaults are w0=1, w1=0, gamma=1, beta=0 (which trivially returns
    # x); use non-trivial values so the BatchNorm branch is exercised.
    w0 = jnp.float32(0.75)
    w1 = jnp.float32(0.25)
    gamma = 1.0 + 0.1 * jax.random.normal(kg, (C,), jnp.float32)
    beta = 0.1 * jax.random.normal(kb, (C,), jnp.float32)

    fwd = jax.jit(adaptive_norm)
    out = jax.block_until_ready(fwd(x, w0, w1, gamma, beta))
    assert out.shape == x.shape, (out.shape, x.shape)
    assert out.dtype == x.dtype, (out.dtype, x.dtype)

    ref = adaptive_norm_ref(x, w0, w1, gamma, beta)
    max_err = float(jnp.max(jnp.abs(out - ref)))
    assert jnp.allclose(out, ref, atol=2e-5, rtol=2e-5), max_err

    print("KERNEL_OK")
</pallas_src>

<mosaic_0001>
module attributes {stable_mosaic.version = 11 : i64} {
  func.func @_stats_kernel(%arg0: i32, %arg1: i32, %arg2: memref<8x256xf32, #tpu.memory_space<vmem>>, %arg3: memref<8x1xf32, #tpu.memory_space<vmem>>, %arg4: memref<8x1xf32, #tpu.memory_space<vmem>>) attributes {dimension_semantics = [#tpu.dimension_semantics<parallel>, #tpu.dimension_semantics<arbitrary>], iteration_bounds = array<i64: 1, 1>, scalar_prefetch = 0 : i64, scratch_operands = 0 : i64, tpu.core_type = #tpu.core_type<tc>, window_params = [{transform_indices = @transform_0, window_bounds = array<i64: 8, 256>}, {transform_indices = @transform_1, window_bounds = array<i64: 8, 1>}, {transform_indices = @transform_2, window_bounds = array<i64: 8, 1>}]} {
    %c0_i32 = arith.constant 0 : i32
    %0 = arith.cmpi eq, %arg1, %c0_i32 : i32
    %1 = arith.extui %0 : i1 to i32
    %c0_i32_0 = arith.constant 0 : i32
    %2 = arith.cmpi ne, %1, %c0_i32_0 : i32
    scf.if %2 {
      %cst_11 = arith.constant 0.000000e+00 : f32
      %15 = vector.broadcast %cst_11 : f32 to vector<8x1xf32>
      %c0_12 = arith.constant 0 : index
      %c0_13 = arith.constant 0 : index
      %16 = vector.load %arg3[%c0_12, %c0_13] : memref<8x1xf32, #tpu.memory_space<vmem>>, vector<8x1xf32>
      tpu.vector_store %arg3[%c0_12, %c0_13], %15 {strides = array<i32>} : memref<8x1xf32, #tpu.memory_space<vmem>>, vector<8x1xf32>,
      %cst_14 = arith.constant 0.000000e+00 : f32
      %17 = vector.broadcast %cst_14 : f32 to vector<8x1xf32>
      %c0_15 = arith.constant 0 : index
      %c0_16 = arith.constant 0 : index
      %18 = vector.load %arg4[%c0_15, %c0_16] : memref<8x1xf32, #tpu.memory_space<vmem>>, vector<8x1xf32>
      tpu.vector_store %arg4[%c0_15, %c0_16], %17 {strides = array<i32>} : memref<8x1xf32, #tpu.memory_space<vmem>>, vector<8x1xf32>,
    } else {
    }
    %c0 = arith.constant 0 : index
    %c0_1 = arith.constant 0 : index
    %3 = vector.load %arg2[%c0, %c0_1] : memref<8x256xf32, #tpu.memory_space<vmem>>, vector<8x256xf32>
    %c0_2 = arith.constant 0 : index
    %c0_3 = arith.constant 0 : index
    %4 = vector.load %arg3[%c0_2, %c0_3] : memref<8x1xf32, #tpu.memory_space<vmem>>, vector<8x1xf32>
    %cst = arith.constant dense<0.000000e+00> : vector<8xf32>
    %5 = vector.multi_reduction <add>, %3, %cst [1] : vector<8x256xf32> to vector<8xf32>
    %6 = vector.shape_cast %5 : vector<8xf32> to vector<8x1xf32>
    %7 = arith.addf %4, %6 : vector<8x1xf32>
    %c0_4 = arith.constant 0 : index
    %c0_5 = arith.constant 0 : index
    %8 = vector.load %arg3[%c0_4, %c0_5] : memref<8x1xf32, #tpu.memory_space<vmem>>, vector<8x1xf32>
    tpu.vector_store %arg3[%c0_4, %c0_5], %7 {strides = array<i32>} : memref<8x1xf32, #tpu.memory_space<vmem>>, vector<8x1xf32>,
    %c0_6 = arith.constant 0 : index
    %c0_7 = arith.constant 0 : index
    %9 = vector.load %arg4[%c0_6, %c0_7] : memref<8x1xf32, #tpu.memory_space<vmem>>, vector<8x1xf32>
    %10 = arith.mulf %3, %3 : vector<8x256xf32>
    %cst_8 = arith.constant dense<0.000000e+00> : vector<8xf32>
    %11 = vector.multi_reduction <add>, %10, %cst_8 [1] : vector<8x256xf32> to vector<8xf32>
    %12 = vector.shape_cast %11 : vector<8xf32> to vector<8x1xf32>
    %13 = arith.addf %9, %12 : vector<8x1xf32>
    %c0_9 = arith.constant 0 : index
    %c0_10 = arith.constant 0 : index
    %14 = vector.load %arg4[%c0_9, %c0_10] : memref<8x1xf32, #tpu.memory_space<vmem>>, vector<8x1xf32>
    tpu.vector_store %arg4[%c0_9, %c0_10], %13 {strides = array<i32>} : memref<8x1xf32, #tpu.memory_space<vmem>>, vector<8x1xf32>,
    return
  }
  func.func @transform_0(%arg0: i32, %arg1: i32) -> (i32, i32) {
    %c0_i32 = arith.constant 0 : i32
    return %arg0, %arg1 : i32, i32
  }
  func.func @transform_1(%arg0: i32, %arg1: i32) -> (i32, i32) {
    %c0_i32 = arith.constant 0 : i32
    %c0_i32_0 = arith.constant 0 : i32
    return %arg0, %c0_i32 : i32, i32
  }
  func.func @transform_2(%arg0: i32, %arg1: i32) -> (i32, i32) {
    %c0_i32 = arith.constant 0 : i32
    %c0_i32_0 = arith.constant 0 : i32
    return %arg0, %c0_i32 : i32, i32
  }
}

module attributes {stable_mosaic.version = 11 : i64} {
  func.func @_affine_kernel(%arg0: i32, %arg1: i32, %arg2: memref<8x256xf32, #tpu.memory_space<vmem>>, %arg3: memref<8x1xf32, #tpu.memory_space<vmem>>, %arg4: memref<8x1xf32, #tpu.memory_space<vmem>>, %arg5: memref<8x256xf32, #tpu.memory_space<vmem>>) attributes {dimension_semantics = [#tpu.dimension_semantics<parallel>, #tpu.dimension_semantics<parallel>], iteration_bounds = array<i64: 1, 1>, scalar_prefetch = 0 : i64, scratch_operands = 0 : i64, tpu.core_type = #tpu.core_type<tc>, window_params = [{transform_indices = @transform_0, window_bounds = array<i64: 8, 256>}, {transform_indices = @transform_1, window_bounds = array<i64: 8, 1>}, {transform_indices = @transform_2, window_bounds = array<i64: 8, 1>}, {transform_indices = @transform_3, window_bounds = array<i64: 8, 256>}]} {
    %c0 = arith.constant 0 : index
    %c0_0 = arith.constant 0 : index
    %0 = vector.load %arg2[%c0, %c0_0] : memref<8x256xf32, #tpu.memory_space<vmem>>, vector<8x256xf32>
    %c0_1 = arith.constant 0 : index
    %c0_2 = arith.constant 0 : index
    %1 = vector.load %arg3[%c0_1, %c0_2] : memref<8x1xf32, #tpu.memory_space<vmem>>, vector<8x1xf32>
    %2 = vector.broadcast %1 : vector<8x1xf32> to vector<8x256xf32>
    %3 = arith.mulf %2, %0 : vector<8x256xf32>
    %c0_3 = arith.constant 0 : index
    %c0_4 = arith.constant 0 : index
    %4 = vector.load %arg4[%c0_3, %c0_4] : memref<8x1xf32, #tpu.memory_space<vmem>>, vector<8x1xf32>
    %5 = vector.broadcast %4 : vector<8x1xf32> to vector<8x256xf32>
    %6 = arith.addf %3, %5 : vector<8x256xf32>
    %c0_5 = arith.constant 0 : index
    %c0_6 = arith.constant 0 : index
    %7 = vector.load %arg5[%c0_5, %c0_6] : memref<8x256xf32, #tpu.memory_space<vmem>>, vector<8x256xf32>
    tpu.vector_store %arg5[%c0_5, %c0_6], %6 {strides = array<i32>} : memref<8x256xf32, #tpu.memory_space<vmem>>, vector<8x256xf32>,
    return
  }
  func.func @transform_0(%arg0: i32, %arg1: i32) -> (i32, i32) {
    %c0_i32 = arith.constant 0 : i32
    return %arg0, %arg1 : i32, i32
  }
  func.func @transform_1(%arg0: i32, %arg1: i32) -> (i32, i32) {
    %c0_i32 = arith.constant 0 : i32
    %c0_i32_0 = arith.constant 0 : i32
    return %arg0, %c0_i32 : i32, i32
  }
  func.func @transform_2(%arg0: i32, %arg1: i32) -> (i32, i32) {
    %c0_i32 = arith.constant 0 : i32
    %c0_i32_0 = arith.constant 0 : i32
    return %arg0, %c0_i32 : i32, i32
  }
  func.func @transform_3(%arg0: i32, %arg1: i32) -> (i32, i32) {
    %c0_i32 = arith.constant 0 : i32
    return %arg0, %arg1 : i32, i32
  }
}

</mosaic_0001>

<bundles_post_ra>
// kernel: tile.18
= control target key start
LH: loop header
LB: loop body
LE: loop exit
PB: predicated region body
PF: predicated region fallthrough
CT: control target
= control target key end

     0   :  { %s22_s0 = inlined_call_operand.vmem [shape: f32[4], index: 0, kind: input, shape index: {}]   ;;  %s23_s1 = inlined_call_operand.vmem [shape: f32[2,4], index: 1, kind: output, shape index: {}]  }
   0x1   :  { %v4_v0 = vld [vmem:[%s22_s0] ss:$0 sm:$0xff] }
   0x2   :  { %5 = vst [vmem:[%s23_s1] sm:$0x3] %v4_v0 }

// kernel: tile.0
= control target key start
LH: loop header
LB: loop body
LE: loop exit
PB: predicated region body
PF: predicated region fallthrough
CT: control target
= control target key end

     0   :  { %s34_s8 = smov 125   ;;  %vm7_vm0 = vcmask 7168   ;;  %s35_s11 = smov 126   ;;  %s61_s0 = inlined_call_operand.vmem [shape: f32[2,4], index: 0, kind: input, shape index: {}]   ;;  %s62_s1 = inlined_call_operand.vmem [shape: f32[8,1], index: 1, kind: output, shape index: {}]  }
   0x1   :  { %v4_v0 = vld [vmem:[%s61_s0] sm:$0x3]  ;;  %s33_s0 = smov 127  }
   0x2   :  { %5 = vst [vmem:[#allocation0] sm:$0x3] %v4_v0 }
   0x9   :  { %v9_v1 = vld [vmem:[#allocation0] sm:$0x3]  }
   0xa   :  { %v21_v2 = vld [vmem:[#allocation0] sm:$0x3]   ;;  %10 = vrot.lane.b32.xlu0 %v9_v1, %s33_s0 }
   0xb   :  { %22 = vrot.lane.b32.xlu1 %v21_v2, %s34_s8  ;;  %v6_v3 = vld [vmem:[#allocation0] sm:$0x3]  }
   0xc   :  { %v15_v4 = vld [vmem:[#allocation0] sm:$0x3]   ;;  %8 = vst.msk [vmem:[%s62_s1] ss:$4 sm:$0x3] %vm7_vm0, %v6_v3  }
   0xe   :  { %16 = vrot.lane.b32.xlu0 %v15_v4, %s35_s11 }
  0x7c   :  { %v11_v5 = vpop.permute.xlu0 %10  }
  0x7d   :  { %v23_v6 = vpop.permute.xlu1 %22   ;;  %27 = vst.msk [vmem:[%s62_s1 + $0x1] ss:$4 sm:$0x3] %vm7_vm0, %v11_v5  }
  0x7e   :  { %29 = vst.msk [vmem:[%s62_s1 + $0x3] ss:$4 sm:$0x3] %vm7_vm0, %v23_v6  }
  0x80   :  { %v17_v7 = vpop.permute.xlu0 %16  }
  0x81   :  { %28 = vst.msk [vmem:[%s62_s1 + $0x2] ss:$4 sm:$0x3] %vm7_vm0, %v17_v7  }

// kernel: adaptive_norm.2
= control target key start
LH: loop header
LB: loop body
LE: loop exit
PB: predicated region body
PF: predicated region fallthrough
CT: control target
= control target key end

     0   :  { %vm14_vm0 = vcmask 7168   ;;  %v43_v2 = vmov 0.0   ;;  %s87_s0 = inlined_call_operand.vmem [shape: f32[8,256], index: 0, kind: input, shape index: {}]   ;;  %s88_s1 = inlined_call_operand.vmem [shape: f32[8,1], index: 1, kind: output, shape index: {0}]   ;;  %s89_s2 = inlined_call_operand.vmem [shape: f32[8,1], index: 2, kind: output, shape index: {1}]  }
   0x1   :  { %v17_v0 = vld [vmem:[%s87_s0] sm:$0xff]  ;;  %v18_v1 = vld [vmem:[%s87_s0 + $0x8] sm:$0xff]  ;;  %15 = vst.msk [vmem:[%s88_s1] sm:$0xff] %vm14_vm0, %v43_v2  ;;  %16 = vst.msk [vmem:[%s89_s2] sm:$0xff] %vm14_vm0, %v43_v2 }
   0x2   :  { %v20_v3 = vadd.f32 %v18_v1, %v17_v0  ;;  %v27_v4 = vmul.f32 %v17_v0, %v17_v0  ;;  %v28_v5 = vmul.f32 %v18_v1, %v18_v1 }
   0x4   :  { %21 = vadd.xlane.f32.xlu0 %v20_v3  ;;  %v29_v6 = vadd.f32 %v28_v5, %v27_v4 }
   0x8   :  { %30 = vadd.xlane.f32.xlu0 %v29_v6  ;;  %v19_v7 = vld [vmem:[%s88_s1] sm:$0xff] }
   0x9   :  { %v26_v10 = vld [vmem:[%s89_s2] sm:$0xff] }
  0x91   :  { %v22_v8 = vpop.xlane.xlu0 %21 }
  0x92   :  { %v23_v9 = vadd.f32 %v22_v8, %v19_v7 }
  0x94   :  { %25 = vst.msk [vmem:[%s88_s1] sm:$0xff] %vm14_vm0, %v23_v9 }
  0x95   :  { %v31_v11 = vpop.xlane.xlu0 %30 }
  0x96   :  { %v32_v12 = vadd.f32 %v31_v11, %v26_v10 }
  0x98   :  { %33 = vst.msk [vmem:[%s89_s2] sm:$0xff] %vm14_vm0, %v32_v12 }

// kernel: adaptive_norm.3
= control target key start
LH: loop header
LB: loop body
LE: loop exit
PB: predicated region body
PF: predicated region fallthrough
CT: control target
= control target key end

     0   :  { %v40_v0 = vmov 0   ;;  %s79_s1 = inlined_call_operand.vmem [shape: f32[8,1], index: 1, kind: input, shape index: {}]   ;;  %s80_s2 = inlined_call_operand.vmem [shape: f32[8,1], index: 2, kind: input, shape index: {}]   ;;  %s81_s0 = inlined_call_operand.vmem [shape: f32[8,256], index: 0, kind: input, shape index: {}]   ;;  %s82_s3 = inlined_call_operand.vmem [shape: f32[8,256], index: 3, kind: output, shape index: {}]  }
   0x1   :  { %39 = vset.pattern.permute.xlu0 %v40_v0  ;;  %v16_v1 = vld [vmem:[%s79_s1] sm:$0xff]  ;;  %v15_v5 = vld [vmem:[%s81_s0 + $0x8] sm:$0xff] }
   0x2   :  { %19 = vperm.xlu0 %39, %v16_v1   ;;  %v24_v2 = vld [vmem:[%s80_s2] sm:$0xff] }
   0x3   :  { %v14_v4 = vld [vmem:[%s81_s0] sm:$0xff] }
   0x6   :  { %27 = vperm.xlu0 %39, %v24_v2  }
  0x81   :  { %v20_v3 = vpop.permute.xlu0 %19 }
  0x82   :  { %v22_v6 = vmul.f32 %v20_v3, %v14_v4  ;;  %v23_v7 = vmul.f32 %v20_v3, %v15_v5 }
  0x85   :  { %v28_v8 = vpop.permute.xlu0 %27 }
  0x86   :  { %v30_v9 = vadd.f32 %v28_v8, %v22_v6  ;;  %v31_v10 = vadd.f32 %v28_v8, %v23_v7 }
  0x88   :  { %32 = vst [vmem:[%s82_s3] sm:$0xff] %v30_v9  ;;  %33 = vst [vmem:[%s82_s3 + $0x8] sm:$0xff] %v31_v10 }

</bundles_post_ra>
